<compile_context>
chip_gen: v7x
topology: tpu7x:2x2x1
jax: 0.10.0
libtpu: 0.0.40
codegen_flags: <defaults>
</compile_context>

<pallas_src>
import jax
import jax.numpy as jnp
from jax.experimental import pallas as pl
from jax.experimental.pallas import tpu as pltpu

N_PAD = 128  # lane-dense padded output width (requires n_tools <= 128)


def _round_up(x, m):
    return ((x + m - 1) // m) * m


def cnn_kernel(xp_ref, cw_ref, cb_ref,
               w1a_ref, w1b_ref, b1_ref,
               w2_ref, b2_ref,
               w3_ref, b3_ref,
               out_ref):
    xp = xp_ref[...]          # (TB, 5)  f32 zero-padded sequence
    cw = cw_ref[...]          # (2, 64)  f32 conv taps (tap, out_ch)
    cb = cb_ref[...]          # (1, 64)  f32

    # Conv1d(1->64, k=2, stride=1, pad=1) + ReLU as VPU broadcast FMAs.
    def conv_at(l):  # l is a static Python int
        y = xp[:, l:l + 1] * cw[0:1, :] + xp[:, l + 1:l + 2] * cw[1:2, :] + cb
        return jnp.maximum(y, 0.0)                # (TB, 64)

    # MaxPool1d(k=2, stride=2): 4 conv positions -> 2 pooled positions.
    p0 = jnp.maximum(conv_at(0), conv_at(1)).astype(jnp.bfloat16)  # pooled l=0
    p1 = jnp.maximum(conv_at(2), conv_at(3)).astype(jnp.bfloat16)  # pooled l=1

    # fc1: the channel-major flatten (idx = c*2 + l) is realized by splitting
    # fc1's weight into even/odd input-column halves -> two MXU passes summed
    # in f32.  No lane concatenation of activations required.
    h1 = (jnp.dot(p0, w1a_ref[...], preferred_element_type=jnp.float32)
          + jnp.dot(p1, w1b_ref[...], preferred_element_type=jnp.float32)
          + b1_ref[...])
    h1 = jnp.maximum(h1, 0.0).astype(jnp.bfloat16)   # (TB, 128); dropout = id (eval)

    h2 = jnp.dot(h1, w2_ref[...], preferred_element_type=jnp.float32) + b2_ref[...]
    h2 = jnp.maximum(h2, 0.0).astype(jnp.bfloat16)   # (TB, 256)

    # fc3 with output padded to 128 lanes -> unmasked lane-dense stores.
    out_ref[...] = (jnp.dot(h2, w3_ref[...], preferred_element_type=jnp.float32)
                    + b3_ref[...])                   # (TB, 128)


def cnn_forward(x, params):
    """x: (B, 3) float32 -> (B, n_tools) float32."""
    B, L = x.shape
    assert L == 3, "fc1.in_features = 2*64 implies Lin = 3"
    conv_w, conv_b, fc1_w, fc1_b, fc2_w, fc2_b, fc3_w, fc3_b = params
    n_tools = fc3_w.shape[0]
    assert n_tools <= N_PAD

    # Batch tiling: fill the MXU M dimension on big batches; keep tiles a
    # multiple of 8 for the sublane constraint.  Small B -> single small tile.
    tile_b = min(256, _round_up(B, 8))
    Bp = _round_up(B, tile_b)
    n_tiles = Bp // tile_b

    # -------- glue (plain JAX): padding + weight re-layout ----------------
    xp = jnp.pad(x.astype(jnp.float32), ((0, Bp - B), (1, 1)))     # (Bp, 5)
    cw = jnp.transpose(conv_w[:, 0, :]).astype(jnp.float32)        # (2, 64)
    cb = conv_b.reshape(1, -1).astype(jnp.float32)                 # (1, 64)
    # Channel-major flatten idx = c*2 + l  ->  split fc1 into even/odd halves.
    w1a = jnp.transpose(fc1_w[:, 0::2]).astype(jnp.bfloat16)       # (64, 128)
    w1b = jnp.transpose(fc1_w[:, 1::2]).astype(jnp.bfloat16)       # (64, 128)
    b1 = fc1_b.reshape(1, -1).astype(jnp.float32)                  # (1, 128)
    w2 = jnp.transpose(fc2_w).astype(jnp.bfloat16)                 # (128, 256)
    b2 = fc2_b.reshape(1, -1).astype(jnp.float32)                  # (1, 256)
    w3 = jnp.zeros((256, N_PAD), jnp.float32
                   ).at[:, :n_tools].set(jnp.transpose(fc3_w)
                                         ).astype(jnp.bfloat16)    # (256, 128)
    b3 = jnp.zeros((1, N_PAD), jnp.float32
                   ).at[:, :n_tools].set(fc3_b.reshape(1, -1))     # (1, 128)

    def batch_spec(cols):
        return pl.BlockSpec((tile_b, cols), lambda i: (i, 0))

    def resident(shape):  # full-array block, constant index -> stays in VMEM
        return pl.BlockSpec(shape, lambda i: (0, 0))

    flops = 2 * Bp * (2 * 64 * 4 + 128 * 128 + 128 * 256 + 256 * N_PAD)
    bytes_accessed = (Bp * (5 + N_PAD) * 4
                      + (128 * 128 + 128 * 256 + 256 * N_PAD) * 2
                      + (2 * 64 + 64 + 128 + 256 + N_PAD) * 4)

    out = pl.pallas_call(
        cnn_kernel,
        out_shape=jax.ShapeDtypeStruct((Bp, N_PAD), jnp.float32),
        grid=(n_tiles,),
        in_specs=[
            batch_spec(5),            # xp
            resident((2, 64)),        # conv weight
            resident((1, 64)),        # conv bias
            resident((64, 128)),      # fc1 weight (even input columns)
            resident((64, 128)),      # fc1 weight (odd input columns)
            resident((1, 128)),       # fc1 bias
            resident((128, 256)),     # fc2 weight
            resident((1, 256)),       # fc2 bias
            resident((256, N_PAD)),   # fc3 weight (lane-padded)
            resident((1, N_PAD)),     # fc3 bias (lane-padded)
        ],
        out_specs=batch_spec(N_PAD),
        compiler_params=pltpu.CompilerParams(
            dimension_semantics=("parallel",),
            vmem_limit_bytes=32 * 1024 * 1024,
        ),
        cost_estimate=pl.CostEstimate(
            flops=flops, transcendentals=0, bytes_accessed=bytes_accessed),
    )(xp, cw, cb, w1a, w1b, b1, w2, b2, w3, b3)

    return out[:B, :n_tools]


def reference_forward(x, params):
    """Pure-JAX f32 reference mirroring the PyTorch module (inference mode)."""
    conv_w, conv_b, fc1_w, fc1_b, fc2_w, fc2_b, fc3_w, fc3_b = params
    B = x.shape[0]
    hp = jax.lax.Precision.HIGHEST
    xp = jnp.pad(x, ((0, 0), (1, 1)))                               # (B, 5)
    conv = jnp.stack(
        [jnp.dot(xp[:, l:l + 2], conv_w[:, 0, :].T, precision=hp) + conv_b
         for l in range(4)], axis=-1)                               # (B, 64, 4)
    conv = jnp.maximum(conv, 0.0)
    pooled = jnp.maximum(conv[..., 0::2], conv[..., 1::2])          # (B, 64, 2)
    flat = pooled.reshape(B, -1)                                    # (B, 128)
    h1 = jnp.maximum(jnp.dot(flat, fc1_w.T, precision=hp) + fc1_b, 0.0)
    h2 = jnp.maximum(jnp.dot(h1, fc2_w.T, precision=hp) + fc2_b, 0.0)
    return jnp.dot(h2, fc3_w.T, precision=hp) + fc3_b


def init_params(key, n_tools):
    ks = jax.random.split(key, 8)
    scale = 0.1
    conv_w = scale * jax.random.normal(ks[0], (64, 1, 2), jnp.float32)
    conv_b = scale * jax.random.normal(ks[1], (64,), jnp.float32)
    fc1_w = scale * jax.random.normal(ks[2], (128, 128), jnp.float32)
    fc1_b = scale * jax.random.normal(ks[3], (128,), jnp.float32)
    fc2_w = scale * jax.random.normal(ks[4], (256, 128), jnp.float32)
    fc2_b = scale * jax.random.normal(ks[5], (256,), jnp.float32)
    fc3_w = scale * jax.random.normal(ks[6], (n_tools, 256), jnp.float32)
    fc3_b = scale * jax.random.normal(ks[7], (n_tools,), jnp.float32)
    return (conv_w, conv_b, fc1_w, fc1_b, fc2_w, fc2_b, fc3_w, fc3_b)


if __name__ == "__main__":
    key = jax.random.PRNGKey(0)
    k_x, k_x2, k_p = jax.random.split(key, 3)

    n_tools = 10           # len(tool_to_index)
    params = init_params(k_p, n_tools)

    # Small primary check (B=8 -> single tile).
    B, L = 8, 3
    x = jax.random.normal(k_x, (B, L), jnp.float32)
    out = jax.block_until_ready(cnn_forward(x, params))
    ref = reference_forward(x, params)
    assert out.shape == (B, n_tools)
    assert jnp.allclose(out, ref, atol=2e-2, rtol=2e-2), \
        float(jnp.max(jnp.abs(out - ref)))

    # Exercise the batch grid + padding path (B=300 -> 2 tiles of 256, sliced back).
    B2 = 300
    x2 = jax.random.normal(k_x2, (B2, L), jnp.float32)
    out2 = jax.block_until_ready(cnn_forward(x2, params))
    ref2 = reference_forward(x2, params)
    assert out2.shape == (B2, n_tools)
    assert jnp.allclose(out2, ref2, atol=2e-2, rtol=2e-2), \
        float(jnp.max(jnp.abs(out2 - ref2)))

    print("KERNEL_OK")
</pallas_src>

<mosaic_0001>
module attributes {stable_mosaic.version = 11 : i64} {
  func.func @cnn_kernel(%arg0: i32, %arg1: memref<8x5xf32, #tpu.memory_space<vmem>>, %arg2: memref<2x64xf32, #tpu.memory_space<vmem>>, %arg3: memref<1x64xf32, #tpu.memory_space<vmem>>, %arg4: memref<64x128xbf16, #tpu.memory_space<vmem>>, %arg5: memref<64x128xbf16, #tpu.memory_space<vmem>>, %arg6: memref<1x128xf32, #tpu.memory_space<vmem>>, %arg7: memref<128x256xbf16, #tpu.memory_space<vmem>>, %arg8: memref<1x256xf32, #tpu.memory_space<vmem>>, %arg9: memref<256x128xbf16, #tpu.memory_space<vmem>>, %arg10: memref<1x128xf32, #tpu.memory_space<vmem>>, %arg11: memref<8x128xf32, #tpu.memory_space<vmem>>) attributes {dimension_semantics = [#tpu.dimension_semantics<parallel>], iteration_bounds = array<i64: 1>, scalar_prefetch = 0 : i64, scratch_operands = 0 : i64, tpu.core_type = #tpu.core_type<tc>, window_params = [{transform_indices = @transform_0, window_bounds = array<i64: 8, 5>}, {pipeline_mode = #tpu.pipeline_mode<synchronous>, transform_indices = @transform_1, window_bounds = array<i64: 2, 64>}, {pipeline_mode = #tpu.pipeline_mode<synchronous>, transform_indices = @transform_2, window_bounds = array<i64: 1, 64>}, {pipeline_mode = #tpu.pipeline_mode<synchronous>, transform_indices = @transform_3, window_bounds = array<i64: 64, 128>}, {pipeline_mode = #tpu.pipeline_mode<synchronous>, transform_indices = @transform_4, window_bounds = array<i64: 64, 128>}, {pipeline_mode = #tpu.pipeline_mode<synchronous>, transform_indices = @transform_5, window_bounds = array<i64: 1, 128>}, {pipeline_mode = #tpu.pipeline_mode<synchronous>, transform_indices = @transform_6, window_bounds = array<i64: 128, 256>}, {pipeline_mode = #tpu.pipeline_mode<synchronous>, transform_indices = @transform_7, window_bounds = array<i64: 1, 256>}, {pipeline_mode = #tpu.pipeline_mode<synchronous>, transform_indices = @transform_8, window_bounds = array<i64: 256, 128>}, {pipeline_mode = #tpu.pipeline_mode<synchronous>, transform_indices = @transform_9, window_bounds = array<i64: 1, 128>}, {transform_indices = @transform_10, window_bounds = array<i64: 8, 128>}]} {
    %c0 = arith.constant 0 : index
    %c0_0 = arith.constant 0 : index
    %0 = vector.load %arg1[%c0, %c0_0] : memref<8x5xf32, #tpu.memory_space<vmem>>, vector<8x5xf32>
    %c0_1 = arith.constant 0 : index
    %c0_2 = arith.constant 0 : index
    %1 = vector.load %arg2[%c0_1, %c0_2] : memref<2x64xf32, #tpu.memory_space<vmem>>, vector<2x64xf32>
    %c0_3 = arith.constant 0 : index
    %c0_4 = arith.constant 0 : index
    %2 = vector.load %arg3[%c0_3, %c0_4] : memref<1x64xf32, #tpu.memory_space<vmem>>, vector<1x64xf32>
    %3 = vector.extract_strided_slice %0 {offsets = [0, 0], sizes = [8, 1], strides = [1, 1]} : vector<8x5xf32> to vector<8x1xf32>
    %4 = vector.extract_strided_slice %1 {offsets = [0, 0], sizes = [1, 64], strides = [1, 1]} : vector<2x64xf32> to vector<1x64xf32>
    %5 = vector.broadcast %3 : vector<8x1xf32> to vector<8x64xf32>
    %6 = vector.broadcast %4 : vector<1x64xf32> to vector<8x64xf32>
    %7 = arith.mulf %5, %6 : vector<8x64xf32>
    %8 = vector.extract_strided_slice %0 {offsets = [0, 1], sizes = [8, 1], strides = [1, 1]} : vector<8x5xf32> to vector<8x1xf32>
    %9 = vector.extract_strided_slice %1 {offsets = [1, 0], sizes = [1, 64], strides = [1, 1]} : vector<2x64xf32> to vector<1x64xf32>
    %10 = vector.broadcast %8 : vector<8x1xf32> to vector<8x64xf32>
    %11 = vector.broadcast %9 : vector<1x64xf32> to vector<8x64xf32>
    %12 = arith.mulf %10, %11 : vector<8x64xf32>
    %13 = arith.addf %7, %12 : vector<8x64xf32>
    %14 = vector.broadcast %2 : vector<1x64xf32> to vector<8x64xf32>
    %15 = arith.addf %13, %14 : vector<8x64xf32>
    %cst = arith.constant 0.000000e+00 : f32
    %16 = vector.broadcast %cst : f32 to vector<8x64xf32>
    %17 = arith.maximumf %15, %16 : vector<8x64xf32>
    %18 = vector.extract_strided_slice %0 {offsets = [0, 1], sizes = [8, 1], strides = [1, 1]} : vector<8x5xf32> to vector<8x1xf32>
    %19 = vector.extract_strided_slice %1 {offsets = [0, 0], sizes = [1, 64], strides = [1, 1]} : vector<2x64xf32> to vector<1x64xf32>
    %20 = vector.broadcast %18 : vector<8x1xf32> to vector<8x64xf32>
    %21 = vector.broadcast %19 : vector<1x64xf32> to vector<8x64xf32>
    %22 = arith.mulf %20, %21 : vector<8x64xf32>
    %23 = vector.extract_strided_slice %0 {offsets = [0, 2], sizes = [8, 1], strides = [1, 1]} : vector<8x5xf32> to vector<8x1xf32>
    %24 = vector.extract_strided_slice %1 {offsets = [1, 0], sizes = [1, 64], strides = [1, 1]} : vector<2x64xf32> to vector<1x64xf32>
    %25 = vector.broadcast %23 : vector<8x1xf32> to vector<8x64xf32>
    %26 = vector.broadcast %24 : vector<1x64xf32> to vector<8x64xf32>
    %27 = arith.mulf %25, %26 : vector<8x64xf32>
    %28 = arith.addf %22, %27 : vector<8x64xf32>
    %29 = vector.broadcast %2 : vector<1x64xf32> to vector<8x64xf32>
    %30 = arith.addf %28, %29 : vector<8x64xf32>
    %cst_5 = arith.constant 0.000000e+00 : f32
    %31 = vector.broadcast %cst_5 : f32 to vector<8x64xf32>
    %32 = arith.maximumf %30, %31 : vector<8x64xf32>
    %33 = arith.maximumf %17, %32 : vector<8x64xf32>
    %34 = arith.truncf %33 : vector<8x64xf32> to vector<8x64xbf16>
    %35 = vector.extract_strided_slice %0 {offsets = [0, 2], sizes = [8, 1], strides = [1, 1]} : vector<8x5xf32> to vector<8x1xf32>
    %36 = vector.extract_strided_slice %1 {offsets = [0, 0], sizes = [1, 64], strides = [1, 1]} : vector<2x64xf32> to vector<1x64xf32>
    %37 = vector.broadcast %35 : vector<8x1xf32> to vector<8x64xf32>
    %38 = vector.broadcast %36 : vector<1x64xf32> to vector<8x64xf32>
    %39 = arith.mulf %37, %38 : vector<8x64xf32>
    %40 = vector.extract_strided_slice %0 {offsets = [0, 3], sizes = [8, 1], strides = [1, 1]} : vector<8x5xf32> to vector<8x1xf32>
    %41 = vector.extract_strided_slice %1 {offsets = [1, 0], sizes = [1, 64], strides = [1, 1]} : vector<2x64xf32> to vector<1x64xf32>
    %42 = vector.broadcast %40 : vector<8x1xf32> to vector<8x64xf32>
    %43 = vector.broadcast %41 : vector<1x64xf32> to vector<8x64xf32>
    %44 = arith.mulf %42, %43 : vector<8x64xf32>
    %45 = arith.addf %39, %44 : vector<8x64xf32>
    %46 = vector.broadcast %2 : vector<1x64xf32> to vector<8x64xf32>
    %47 = arith.addf %45, %46 : vector<8x64xf32>
    %cst_6 = arith.constant 0.000000e+00 : f32
    %48 = vector.broadcast %cst_6 : f32 to vector<8x64xf32>
    %49 = arith.maximumf %47, %48 : vector<8x64xf32>
    %50 = vector.extract_strided_slice %0 {offsets = [0, 3], sizes = [8, 1], strides = [1, 1]} : vector<8x5xf32> to vector<8x1xf32>
    %51 = vector.extract_strided_slice %1 {offsets = [0, 0], sizes = [1, 64], strides = [1, 1]} : vector<2x64xf32> to vector<1x64xf32>
    %52 = vector.broadcast %50 : vector<8x1xf32> to vector<8x64xf32>
    %53 = vector.broadcast %51 : vector<1x64xf32> to vector<8x64xf32>
    %54 = arith.mulf %52, %53 : vector<8x64xf32>
    %55 = vector.extract_strided_slice %0 {offsets = [0, 4], sizes = [8, 1], strides = [1, 1]} : vector<8x5xf32> to vector<8x1xf32>
    %56 = vector.extract_strided_slice %1 {offsets = [1, 0], sizes = [1, 64], strides = [1, 1]} : vector<2x64xf32> to vector<1x64xf32>
    %57 = vector.broadcast %55 : vector<8x1xf32> to vector<8x64xf32>
    %58 = vector.broadcast %56 : vector<1x64xf32> to vector<8x64xf32>
    %59 = arith.mulf %57, %58 : vector<8x64xf32>
    %60 = arith.addf %54, %59 : vector<8x64xf32>
    %61 = vector.broadcast %2 : vector<1x64xf32> to vector<8x64xf32>
    %62 = arith.addf %60, %61 : vector<8x64xf32>
    %cst_7 = arith.constant 0.000000e+00 : f32
    %63 = vector.broadcast %cst_7 : f32 to vector<8x64xf32>
    %64 = arith.maximumf %62, %63 : vector<8x64xf32>
    %65 = arith.maximumf %49, %64 : vector<8x64xf32>
    %66 = arith.truncf %65 : vector<8x64xf32> to vector<8x64xbf16>
    %c0_8 = arith.constant 0 : index
    %c0_9 = arith.constant 0 : index
    %67 = vector.load %arg4[%c0_8, %c0_9] : memref<64x128xbf16, #tpu.memory_space<vmem>>, vector<64x128xbf16>
    %cst_10 = arith.constant dense<0.000000e+00> : vector<8x128xf32>
    %68 = tpu.matmul %34, %67, %cst_10 {dimension_numbers = #tpu.dot_dimension_numbers<[1], [0], [0], [1], [0, 0, 1, 1], [], []>} : vector<8x64xbf16>, vector<64x128xbf16>, vector<8x128xf32> -> vector<8x128xf32>
    %c0_11 = arith.constant 0 : index
    %c0_12 = arith.constant 0 : index
    %69 = vector.load %arg5[%c0_11, %c0_12] : memref<64x128xbf16, #tpu.memory_space<vmem>>, vector<64x128xbf16>
    %cst_13 = arith.constant dense<0.000000e+00> : vector<8x128xf32>
    %70 = tpu.matmul %66, %69, %cst_13 {dimension_numbers = #tpu.dot_dimension_numbers<[1], [0], [0], [1], [0, 0, 1, 1], [], []>} : vector<8x64xbf16>, vector<64x128xbf16>, vector<8x128xf32> -> vector<8x128xf32>
    %71 = arith.addf %68, %70 : vector<8x128xf32>
    %c0_14 = arith.constant 0 : index
    %c0_15 = arith.constant 0 : index
    %72 = vector.load %arg6[%c0_14, %c0_15] : memref<1x128xf32, #tpu.memory_space<vmem>>, vector<1x128xf32>
    %73 = vector.broadcast %72 : vector<1x128xf32> to vector<8x128xf32>
    %74 = arith.addf %71, %73 : vector<8x128xf32>
    %cst_16 = arith.constant 0.000000e+00 : f32
    %75 = vector.broadcast %cst_16 : f32 to vector<8x128xf32>
    %76 = arith.maximumf %74, %75 : vector<8x128xf32>
    %77 = arith.truncf %76 : vector<8x128xf32> to vector<8x128xbf16>
    %c0_17 = arith.constant 0 : index
    %c0_18 = arith.constant 0 : index
    %78 = vector.load %arg7[%c0_17, %c0_18] : memref<128x256xbf16, #tpu.memory_space<vmem>>, vector<128x256xbf16>
    %cst_19 = arith.constant dense<0.000000e+00> : vector<8x256xf32>
    %79 = tpu.matmul %77, %78, %cst_19 {dimension_numbers = #tpu.dot_dimension_numbers<[1], [0], [0], [1], [0, 0, 1, 1], [], []>} : vector<8x128xbf16>, vector<128x256xbf16>, vector<8x256xf32> -> vector<8x256xf32>
    %c0_20 = arith.constant 0 : index
    %c0_21 = arith.constant 0 : index
    %80 = vector.load %arg8[%c0_20, %c0_21] : memref<1x256xf32, #tpu.memory_space<vmem>>, vector<1x256xf32>
    %81 = vector.broadcast %80 : vector<1x256xf32> to vector<8x256xf32>
    %82 = arith.addf %79, %81 : vector<8x256xf32>
    %cst_22 = arith.constant 0.000000e+00 : f32
    %83 = vector.broadcast %cst_22 : f32 to vector<8x256xf32>
    %84 = arith.maximumf %82, %83 : vector<8x256xf32>
    %85 = arith.truncf %84 : vector<8x256xf32> to vector<8x256xbf16>
    %c0_23 = arith.constant 0 : index
    %c0_24 = arith.constant 0 : index
    %86 = vector.load %arg9[%c0_23, %c0_24] : memref<256x128xbf16, #tpu.memory_space<vmem>>, vector<256x128xbf16>
    %cst_25 = arith.constant dense<0.000000e+00> : vector<8x128xf32>
    %87 = tpu.matmul %85, %86, %cst_25 {dimension_numbers = #tpu.dot_dimension_numbers<[1], [0], [0], [1], [0, 0, 1, 1], [], []>} : vector<8x256xbf16>, vector<256x128xbf16>, vector<8x128xf32> -> vector<8x128xf32>
    %c0_26 = arith.constant 0 : index
    %c0_27 = arith.constant 0 : index
    %88 = vector.load %arg10[%c0_26, %c0_27] : memref<1x128xf32, #tpu.memory_space<vmem>>, vector<1x128xf32>
    %89 = vector.broadcast %88 : vector<1x128xf32> to vector<8x128xf32>
    %90 = arith.addf %87, %89 : vector<8x128xf32>
    %c0_28 = arith.constant 0 : index
    %c0_29 = arith.constant 0 : index
    %91 = vector.load %arg11[%c0_28, %c0_29] : memref<8x128xf32, #tpu.memory_space<vmem>>, vector<8x128xf32>
    tpu.vector_store %arg11[%c0_28, %c0_29], %90 {strides = array<i32>} : memref<8x128xf32, #tpu.memory_space<vmem>>, vector<8x128xf32>,
    return
  }
  func.func @transform_0(%arg0: i32) -> (i32, i32) {
    %c0_i32 = arith.constant 0 : i32
    %c0_i32_0 = arith.constant 0 : i32
    return %arg0, %c0_i32 : i32, i32
  }
  func.func @transform_1(%arg0: i32) -> (i32, i32) {
    %c0_i32 = arith.constant 0 : i32
    %c0_i32_0 = arith.constant 0 : i32
    %c0_i32_1 = arith.constant 0 : i32
    return %c0_i32, %c0_i32_0 : i32, i32
  }
  func.func @transform_2(%arg0: i32) -> (i32, i32) {
    %c0_i32 = arith.constant 0 : i32
    %c0_i32_0 = arith.constant 0 : i32
    %c0_i32_1 = arith.constant 0 : i32
    return %c0_i32, %c0_i32_0 : i32, i32
  }
  func.func @transform_3(%arg0: i32) -> (i32, i32) {
    %c0_i32 = arith.constant 0 : i32
    %c0_i32_0 = arith.constant 0 : i32
    %c0_i32_1 = arith.constant 0 : i32
    return %c0_i32, %c0_i32_0 : i32, i32
  }
  func.func @transform_4(%arg0: i32) -> (i32, i32) {
    %c0_i32 = arith.constant 0 : i32
    %c0_i32_0 = arith.constant 0 : i32
    %c0_i32_1 = arith.constant 0 : i32
    return %c0_i32, %c0_i32_0 : i32, i32
  }
  func.func @transform_5(%arg0: i32) -> (i32, i32) {
    %c0_i32 = arith.constant 0 : i32
    %c0_i32_0 = arith.constant 0 : i32
    %c0_i32_1 = arith.constant 0 : i32
    return %c0_i32, %c0_i32_0 : i32, i32
  }
  func.func @transform_6(%arg0: i32) -> (i32, i32) {
    %c0_i32 = arith.constant 0 : i32
    %c0_i32_0 = arith.constant 0 : i32
    %c0_i32_1 = arith.constant 0 : i32
    return %c0_i32, %c0_i32_0 : i32, i32
  }
  func.func @transform_7(%arg0: i32) -> (i32, i32) {
    %c0_i32 = arith.constant 0 : i32
    %c0_i32_0 = arith.constant 0 : i32
    %c0_i32_1 = arith.constant 0 : i32
    return %c0_i32, %c0_i32_0 : i32, i32
  }
  func.func @transform_8(%arg0: i32) -> (i32, i32) {
    %c0_i32 = arith.constant 0 : i32
    %c0_i32_0 = arith.constant 0 : i32
    %c0_i32_1 = arith.constant 0 : i32
    return %c0_i32, %c0_i32_0 : i32, i32
  }
  func.func @transform_9(%arg0: i32) -> (i32, i32) {
    %c0_i32 = arith.constant 0 : i32
    %c0_i32_0 = arith.constant 0 : i32
    %c0_i32_1 = arith.constant 0 : i32
    return %c0_i32, %c0_i32_0 : i32, i32
  }
  func.func @transform_10(%arg0: i32) -> (i32, i32) {
    %c0_i32 = arith.constant 0 : i32
    %c0_i32_0 = arith.constant 0 : i32
    return %arg0, %c0_i32 : i32, i32
  }
}

</mosaic_0001>

<bundles_post_ra>
// kernel: tpu_custom_call.1
= control target key start
LH: loop header
LB: loop body
LE: loop exit
PB: predicated region body
PF: predicated region fallthrough
CT: control target
= control target key end

     0   :  { %15 = vsyncpa [#allocation3], 0  ;;  %s1173_s0 = inlined_call_operand.hbm [shape: f32[8,5], index: 0, kind: input, shape index: {}]   ;;  %s1174_s1 = inlined_call_operand.vmem [shape: f32[2,64], index: 1, kind: input, shape index: {}]   ;;  %s1175_s2 = inlined_call_operand.vmem [shape: f32[1,64], index: 2, kind: input, shape index: {}]   ;;  %s1176_s3 = inlined_call_operand.hbm [shape: bf16[64,128], index: 3, kind: input, shape index: {}]   ;;  %s1177_s4 = inlined_call_operand.hbm [shape: bf16[64,128], index: 4, kind: input, shape index: {}]   ;;  %s1178_s5 = inlined_call_operand.vmem [shape: f32[1,128], index: 5, kind: input, shape index: {}]   ;;  %s1179_s6 = inlined_call_operand.hbm [shape: bf16[128,256], index: 6, kind: input, shape index: {}]   ;;  %s1180_s7 = inlined_call_operand.vmem [shape: f32[1,256], index: 7, kind: input, shape index: {}]   ;;  %s1181_s8 = inlined_call_operand.hbm [shape: bf16[256,128], index: 8, kind: input, shape index: {}]   ;;  %s1182_s9 = inlined_call_operand.vmem [shape: f32[1,128], index: 9, kind: input, shape index: {}]   ;;  %s1183_s10 = inlined_call_operand.hbm [shape: f32[8,128], index: 10, kind: output, shape index: {}]  }
   0x1   :  { %16 = vsyncpa [#allocation6], 0 }
   0x2   :  { %17 = vsyncpa [#allocation9], 0 }
   0x3   :  { %18 = vsyncpa [#allocation4], 0  ;;  %s984_s13 = smov [#allocation5]   ;;  %s844_s17 = scalar_lea.hbm %s1176_s3, 512 }
   0x4   :  { %s38_s14 = sshll.u32 %s984_s13, 4  ;;  %p845_p0 = scmp.ne.s32.totalorder %s1176_s3, %s844_s17  ;;  %s39_s14 = int_to_ptr.vmem [resolvable:$true] %s38_s14 }
   0x5   :  { %p848_p1 = scmp.lt.u32.totalorder %s844_s17, %s1176_s3 }
   0x7   :  { %p850_p2 = pnand %p848_p1, %p845_p0 }
   0x9   :  { %853 = shalt.err (!%p850_p2)
}
   0xa   :  { %s854_s22 = scalar_lea.vmem %s39_s14, 512  ;;  %p859_p4 = scmp.lt.s32.totalorder %s39_s14, %s39_s14 }
   0xb   :  { %p855_p3 = scmp.ne.s32.totalorder %s39_s14, %s854_s22  ;;  %p860_p5 = scmp.lt.s32.totalorder %s854_s22, %s854_s22 }
   0xd   :  { %p861_p6 = por %p860_p5, %p859_p4 }
   0xf   :  { %p862_p7 = pnand %p861_p6, %p855_p3 }
  0x11   :  { %865 = shalt.err (!%p862_p7)
}
  0x12   :  { %s985_s23 = smov 64   ;;  %s986_s24 = smov 4  }
  0x13   :  { %44 = dma.hbm_to_vmem [thread:$0]  %s1176_s3, 512, %s39_s14, [#allocation6], %s985_s23, %s985_s23, %s986_s24  }
  0x14   :  { %s987_s27 = smov [#allocation8]   ;;  %s866_s11 = scalar_lea.hbm %s1179_s6, 2048 }
  0x15   :  { %s64_s28 = sshll.u32 %s987_s27, 4  ;;  %p867_p8 = scmp.ne.s32.totalorder %s1179_s6, %s866_s11  ;;  %s65_s28 = int_to_ptr.vmem [resolvable:$true] %s64_s28 }
  0x16   :  { %p870_p9 = scmp.lt.u32.totalorder %s866_s11, %s1179_s6 }
  0x18   :  { %p872_p10 = pnand %p870_p9, %p867_p8 }
  0x1a   :  { %875 = shalt.err (!%p872_p10)
}
  0x1b   :  { %s876_s17 = scalar_lea.vmem %s65_s28, 2048  ;;  %p881_p12 = scmp.lt.s32.totalorder %s65_s28, %s65_s28 }
  0x1c   :  { %p877_p11 = scmp.ne.s32.totalorder %s65_s28, %s876_s17  ;;  %p882_p13 = scmp.lt.s32.totalorder %s876_s17, %s876_s17 }
  0x1e   :  { %p883_p0 = por %p882_p13, %p881_p12 }
  0x20   :  { %p884_p1 = pnand %p883_p0, %p877_p11 }
  0x22   :  { %887 = shalt.err (!%p884_p1)
}
  0x23   :  { %s988_s3 = smov 128   ;;  %s989_s14 = smov 8  }
  0x24   :  { %70 = dma.hbm_to_vmem [thread:$0]  %s1179_s6, 2048, %s65_s28, [#allocation9], %s988_s3, %s988_s3, %s989_s14  }
  0x25   :  { %s990_s20 = smov [#allocation2]   ;;  %s991_s22 = smov [#allocation7]  }
  0x26   :  { %s25_s21 = sshll.u32 %s990_s20, 4  ;;  %s50_s25 = sshll.u32 %s991_s22, 4  ;;  %s26_s21 = int_to_ptr.vmem [resolvable:$true] %s25_s21  ;;  %s1083_s25 = int_to_ptr.vmem [resolvable:$true] %s50_s25 }
  0x27   :  { %s888_s29 = scalar_lea.hbm %s1173_s0, 128 }
  0x28   :  { %p889_p2 = scmp.ne.s32.totalorder %s1173_s0, %s888_s29  ;;  %p892_p3 = scmp.lt.u32.totalorder %s888_s29, %s1173_s0 }
  0x2a   :  { %p894_p4 = pnand %p892_p3, %p889_p2 }
  0x2c   :  { %897 = shalt.err (!%p894_p4)
}
  0x2d   :  { %s898_s6 = scalar_lea.vmem %s26_s21, 128  ;;  %p903_p6 = scmp.lt.s32.totalorder %s26_s21, %s26_s21 }
  0x2e   :  { %p899_p5 = scmp.ne.s32.totalorder %s26_s21, %s898_s6  ;;  %p904_p7 = scmp.lt.s32.totalorder %s898_s6, %s898_s6 }
  0x30   :  { %p905_p8 = por %p904_p7, %p903_p6 }
  0x32   :  { %p906_p9 = pnand %p905_p8, %p899_p5 }
  0x34   :  { %909 = shalt.err (!%p906_p9)
}
  0x35   :  { %28 = dma.hbm_to_vmem [thread:$0]  %s1173_s0, 128, %s26_s21, [#allocation3]  }
  0x36   :  { %s910_s3 = scalar_lea.hbm %s1177_s4, 512 }
  0x37   :  { %p911_p10 = scmp.ne.s32.totalorder %s1177_s4, %s910_s3  ;;  %p914_p11 = scmp.lt.u32.totalorder %s910_s3, %s1177_s4 }
  0x39   :  { %p916_p12 = pnand %p914_p11, %p911_p10 }
  0x3b   :  { %919 = shalt.err (!%p916_p12)
}
  0x3c   :  { %s920_s22 = scalar_lea.vmem %s1083_s25, 512  ;;  %p925_p0 = scmp.lt.s32.totalorder %s1083_s25, %s1083_s25 }
  0x3d   :  { %p921_p13 = scmp.ne.s32.totalorder %s1083_s25, %s920_s22  ;;  %p926_p1 = scmp.lt.s32.totalorder %s920_s22, %s920_s22 }
  0x3f   :  { %p927_p2 = por %p926_p1, %p925_p0 }
  0x41   :  { %p928_p3 = pnand %p927_p2, %p921_p13 }
  0x43   :  { %931 = shalt.err (!%p928_p3)
}
  0x44   :  { %56 = dma.hbm_to_vmem [thread:$0]  %s1177_s4, 512, %s1083_s25, [#allocation6], %s985_s23, %s985_s23, %s986_s24  }
  0x45   :  { %s992_s26 = smov [#allocation10]   ;;  %s932_s11 = scalar_lea.hbm %s1181_s8, 2048 }
  0x46   :  { %s78_s27 = sshll.u32 %s992_s26, 4  ;;  %p933_p4 = scmp.ne.s32.totalorder %s1181_s8, %s932_s11  ;;  %s79_s27 = int_to_ptr.vmem [resolvable:$true] %s78_s27 }
  0x47   :  { %p936_p5 = scmp.lt.u32.totalorder %s932_s11, %s1181_s8 }
  0x49   :  { %p938_p6 = pnand %p936_p5, %p933_p4 }
  0x4b   :  { %941 = shalt.err (!%p938_p6)
}
  0x4c   :  { %s942_s15 = scalar_lea.vmem %s79_s27, 2048  ;;  %p947_p8 = scmp.lt.s32.totalorder %s79_s27, %s79_s27 }
  0x4d   :  { %p943_p7 = scmp.ne.s32.totalorder %s79_s27, %s942_s15  ;;  %p948_p9 = scmp.lt.s32.totalorder %s942_s15, %s942_s15 }
  0x4f   :  { %p949_p10 = por %p948_p9, %p947_p8 }
  0x51   :  { %p950_p11 = pnand %p949_p10, %p943_p7 }
  0x53   :  { %953 = shalt.err (!%p950_p11)
}
  0x54   :  { %84 = dma.hbm_to_vmem [thread:$0]  %s1181_s8, 2048, %s79_s27, [#allocation9], %s985_s23, %s985_s23, %s986_s24  }
  0x55   :  { %976 = dma.done.wait [#allocation3], 128  }
  0x56   :  { %977 = vsyncadd [#allocation3], 4294967168 }
  0x57   :  { %978 = dma.done.wait [#allocation6], 1024  }
  0x58   :  { %979 = vsyncadd [#allocation6], 4294966272 }
  0x59   :  { %980 = dma.done.wait [#allocation9], 4096  }
  0x5a   :  { %981 = vsyncadd [#allocation9], 4294963200  ;;  %v993_v0 = vmov 2   ;;  %v994_v1 = vmov 0   ;;  %v103_v2 = vld [vmem:[#allocation2] sm:$0xff]  ;;  %v796_v3 = vld [vmem:[#allocation5] sm:$0xff]   ;;  %v111_v16 = vlaneseq }
  0x5b   :  { %792 = vset.pattern.permute.xlu1 %v993_v0  ;;  %790 = vset.pattern.permute.xlu0 %v994_v1  ;;  %v995_v4 = vmov 0.0   ;;  %v996_v5 = vmov 3   ;;  %v997_v6 = vmov 1   ;;  %v797_v7 = vld [vmem:[#allocation5 + $0x8] sm:$0xff]   ;;  %v798_v8 = vld [vmem:[#allocation7] sm:$0xff]   ;;  %v799_v9 = vld [vmem:[#allocation5 + $0x10] sm:$0xff]  }
  0x5c   :  { %136 = vperm.xlu1 %792, %v103_v2   ;;  %108 = vperm.xlu0 %790, %v103_v2   ;;  %v998_v10 = vmov 4   ;;  %v800_v11 = vld [vmem:[#allocation7 + $0x8] sm:$0xff]   ;;  %v801_v12 = vld [vmem:[#allocation5 + $0x18] sm:$0xff]   ;;  %v802_v13 = vld [vmem:[#allocation7 + $0x10] sm:$0xff]   ;;  %vm999_vm0 = vmmov 0   ;;  %v1133_v17 = vshrl.u32 %v111_v16, 7 }
  0x5d   :  { %761 = vmatprep.subr.bf16.mxu1 %v995_v4  ;;  %749 = vmatprep.subr.bf16.mxu0 %v995_v4  ;;  %v803_v14 = vld [vmem:[#allocation7 + $0x18] sm:$0xff]   ;;  %v806_v15 = vld [vmem:[#allocation8 + $0x4] ss:$8 sps:$4 sm:$0xff]   ;;  %vm205_vm1 = vcmask 523264   ;;  %v804_v52 = vld [vmem:[#allocation8] ss:$8 sps:$4 sm:$0xff]  }
  0x5e   :  { %762 = vmatpush3.bf16.msra.mxu1 %v796_v3  ;;  %750 = vmatpush3.bf16.msra.mxu0 %v798_v8  ;;  %v113_v18 = vsub.s32 0, %v1133_v17  ;;  %v122_v19 = vsub.s32 1, %v1133_v17  ;;  %v104_v20 = vld [vmem:[%s1174_s1] sm:$0x3]  ;;  %v809_v54 = vld [vmem:[#allocation8 + $0x14] ss:$8 sps:$4 sm:$0xff]  }
  0x5f   :  { %763 = vmatprep.subr.bf16.mxu1 %v995_v4  ;;  %751 = vmatprep.subr.bf16.mxu0 %v995_v4  ;;  %v672_v33 = vld [vmem:[%s1175_s2] ss:$0 sm:$0xff]  ;;  %v812_v56 = vld [vmem:[#allocation8 + $0x24] ss:$8 sps:$4 sm:$0xff]   ;;  %v810_v57 = vld [vmem:[#allocation8 + $0x20] ss:$8 sps:$4 sm:$0xff]  }
  0x60   :  { %793 = vset.pattern.permute.xlu1 %v996_v5  ;;  %791 = vset.pattern.permute.xlu0 %v997_v6  ;;  %v114_v23 = vrot.slane %v104_v20, %v113_v18  ;;  %v123_v24 = vrot.slane %v104_v20, %v122_v19  ;;  %v807_v55 = vld [vmem:[#allocation8 + $0x10] ss:$8 sps:$4 sm:$0xff]   ;;  %v815_v58 = vld [vmem:[#allocation8 + $0x34] ss:$8 sps:$4 sm:$0xff]   ;;  %v818_v60 = vld [vmem:[#allocation8 + $0x44] ss:$8 sps:$4 sm:$0xff]  }
  0x61   :  { %147 = vperm.xlu1 %793, %v103_v2   ;;  %117 = vperm.xlu0 %791, %v103_v2   ;;  %v813_v59 = vld [vmem:[#allocation8 + $0x30] ss:$8 sps:$4 sm:$0xff]   ;;  %v816_v61 = vld [vmem:[#allocation8 + $0x40] ss:$8 sps:$4 sm:$0xff]   ;;  %v821_v62 = vld [vmem:[#allocation8 + $0x54] ss:$8 sps:$4 sm:$0xff]  }
  0x62   :  { %764 = vmatpush3.bf16.msra.mxu1 %v797_v7  ;;  %752 = vmatpush3.bf16.msra.mxu0 %v800_v11  ;;  %v819_v63 = vld [vmem:[#allocation8 + $0x50] ss:$8 sps:$4 sm:$0xff]   ;;  %v824_v0 = vld [vmem:[#allocation8 + $0x64] ss:$8 sps:$4 sm:$0xff]   ;;  %s1000_s14 = smov [#allocation11]  }
  0x63   :  { %765 = vmatprep.subr.bf16.mxu1 %v995_v4  ;;  %753 = vmatprep.subr.bf16.mxu0 %v995_v4  ;;  %v825_v3 = vld [vmem:[#allocation8 + $0x70] ss:$8 sps:$4 sm:$0xff]   ;;  %v829_v5 = vld [vmem:[#allocation10] sm:$0xff]   ;;  %v830_v6 = vld [vmem:[#allocation10 + $0x48] sm:$0xff]   ;;  %s661_s18 = sshll.u32 %s1000_s14, 4  ;;  %s662_s18 = int_to_ptr.vmem [resolvable:$true] %s661_s18 }
  0x64   :  { %769 = vmatprep.mubr.msk.bf16.mxu1 %vm999_vm0, %v995_v4  ;;  %757 = vmatprep.mubr.msk.bf16.mxu0 %vm999_vm0, %v995_v4  ;;  %v831_v7 = vld [vmem:[#allocation10 + $0x8] sm:$0xff]   ;;  %v832_v8 = vld [vmem:[#allocation10 + $0x50] sm:$0xff]   ;;  %v835_v11 = vld [vmem:[#allocation10 + $0x18] sm:$0xff]   ;;  %s954_s19 = scalar_lea.vmem %s662_s18, 128  ;;  %p959_p13 = scmp.lt.s32.totalorder %s662_s18, %s662_s18 }
  0x65   :  { %794 = vset.pattern.permute.xlu1 %v998_v10  ;;  %795 = vset.pattern.permute.xlu0 %v998_v10  ;;  %v834_v10 = vld [vmem:[#allocation10 + $0x58] sm:$0xff]   ;;  %p955_p12 = scmp.ne.s32.totalorder %s662_s18, %s954_s19  ;;  %p960_p0 = scmp.lt.s32.totalorder %s954_s19, %s954_s19 }
  0x66   :  { %156 = vperm.xlu1 %794, %v103_v2   ;;  %766 = vmatpush3.bf16.msra.mxu1 %v799_v9  ;;  %v827_v2 = vld [vmem:[#allocation8 + $0x74] ss:$8 sps:$4 sm:$0xff]  }
  0x67   :  { %767 = vmatprep.subr.bf16.mxu1 %v995_v4  ;;  %754 = vmatpush3.bf16.msra.mxu0 %v802_v13  ;;  %v833_v9 = vld [vmem:[#allocation10 + $0x10] sm:$0xff]   ;;  %v837_v13 = vld [vmem:[#allocation10 + $0x20] sm:$0xff]   ;;  %p961_p1 = por %p960_p0, %p959_p13 }
  0x68   :  { %755 = vmatprep.subr.bf16.mxu0 %v995_v4  ;;  %v828_v4 = vld [vmem:[#allocation10 + $0x40] sm:$0xff]  }
  0x69   :  { %p962_p2 = pnand %p961_p1, %p955_p12 }
  0x6a   :  { %768 = vmatpush3.bf16.msra.mxu1 %v801_v12  ;;  %v836_v12 = vld [vmem:[#allocation10 + $0x60] sm:$0xff]  }
  0x6b   :  { %756 = vmatpush3.bf16.msra.mxu0 %v803_v14  ;;  %727 = vmatprep.subr.bf16.mxu1 %v828_v4  ;;  %v838_v14 = vld [vmem:[#allocation10 + $0x68] sm:$0xff]  }
  0x6c   :  { %434 = vmatprep.subr.bf16.mxu0 %v806_v15  ;;  %v839_v15 = vld [vmem:[#allocation10 + $0x28] sm:$0xff]  }
  0xdb   :  { %v137_v21 = vpop.permute.xlu1 %136  ;;  %v109_v22 = vpop.permute.xlu0 %108 }
  0xdc   :  { %v115_v25 = vmul.f32 %v114_v23, %v109_v22  ;;  %v139_v28 = vmul.f32 %v137_v21, %v123_v24  ;;  %v145_v32 = vmul.f32 %v137_v21, %v114_v23 }
  0xe0   :  { %v148_v26 = vpop.permute.xlu1 %147  ;;  %v118_v27 = vpop.permute.xlu0 %117 }
  0xe1   :  { %v150_v29 = vmul.f32 %v148_v26, %v123_v24  ;;  %v124_v30 = vmul.f32 %v123_v24, %v118_v27  ;;  %v134_v31 = vmul.f32 %v118_v27, %v114_v23  ;;  %v154_v40 = vmul.f32 %v148_v26, %v114_v23 }
  0xe3   :  { %v125_v34 = vadd.f32 %v124_v30, %v115_v25  ;;  %v140_v35 = vadd.f32 %v139_v28, %v134_v31  ;;  %v151_v36 = vadd.f32 %v150_v29, %v145_v32  ;;  %v840_v32 = vld [vmem:[#allocation10 + $0x70] sm:$0xff]  }
  0xe5   :  { %v132_v37 = vadd.f32 %v672_v33, %v125_v34  ;;  %v141_v38 = vadd.f32 %v672_v33, %v140_v35  ;;  %v157_v39 = vpop.permute.xlu1 %156  ;;  %v152_v44 = vadd.f32 %v672_v33, %v151_v36  ;;  %v842_v34 = vld [vmem:[#allocation10 + $0x78] sm:$0xff]  }
  0xe6   :  { %v159_v41 = vmul.f32 %v157_v39, %v123_v24  ;;  %v683_v24 = vld [vmem:[%s1178_s5] ss:$0 sm:$0xff] }
  0xe7   :  { %v133_v42 = vmax.f32 %v132_v37, 0.0  ;;  %v142_v43 = vmax.f32 %v141_v38, 0.0  ;;  %v153_v49 = vmax.f32 %v152_v44, 0.0  ;;  %v843_v35 = vld [vmem:[#allocation10 + $0x38] sm:$0xff]  }
  0xe8   :  { %v160_v45 = vadd.f32 %v159_v41, %v154_v40  ;;  %v342_v36 = vld [vmem:[%s1180_s7] sm:$0x3] }
  0xe9   :  { %v143_v46 = vmax.f32 %v133_v42, %v142_v43  ;;  %v347_v37 = vrot.slane %v342_v36, %v113_v18  ;;  %v351_v38 = vrot.slane %v342_v36, %v122_v19  ;;  %v700_v18 = vld [vmem:[%s1182_s9] ss:$0 sm:$0xff] }
  0xea   :  { %v161_v47 = vadd.f32 %v672_v33, %v160_v45  ;;  %v841_v33 = vld [vmem:[#allocation10 + $0x30] sm:$0xff]  }
  0xeb   :  { %v144_v48 = vpack.c.bf16 %v143_v46, %v143_v46 }
  0xec   :  { %v162_v50 = vmax.f32 %v161_v47, 0.0 }
  0xed   :  { %770 = vmatmul.mubr.msk.bf16.vlgmr.msra.gmra.mrb[0].mxu1 %vm205_vm1, %v144_v48 }
  0xee   :  { %v163_v51 = vmax.f32 %v153_v49, %v162_v50  ;;  %728 = vmatpush3.bf16.msra.mxu1 %v829_v5 }
  0xef   :  { %729 = vmatprep.subr.bf16.mxu1 %v830_v6 }
  0xf0   :  { %v164_v53 = vpack.c.bf16 %v163_v51, %v163_v51 }
  0xf2   :  { %758 = vmatmul.mubr.msk.bf16.vlgmr.msra.gmra.mrb[0].mxu0 %vm205_vm1, %v164_v53  ;;  %730 = vmatpush3.bf16.msra.mxu1 %v831_v7 }
  0xf3   :  { %435 = vmatpush1.bf16.msra.mxu0 %v804_v52  ;;  %466 = vmatprep.mubr.bf16.mxu0 %v994_v1  ;;  %v822_v1 = vld [vmem:[#allocation8 + $0x60] ss:$8 sps:$4 sm:$0xff]  }
  0xf4   :  { %436 = vmatprep.subr.bf16.mxu0 %v809_v54  ;;  %731 = vmatprep.subr.bf16.mxu1 %v832_v8 }
  0xf6   :  { %732 = vmatpush3.bf16.msra.mxu1 %v833_v9 }
  0xf7   :  { %437 = vmatpush1.bf16.msra.mxu0 %v807_v55  ;;  %733 = vmatprep.subr.bf16.mxu1 %v834_v10 }
  0xf8   :  { %438 = vmatprep.subr.bf16.mxu0 %v812_v56 }
  0xfa   :  { %734 = vmatpush3.bf16.msra.mxu1 %v835_v11 }
  0xfb   :  { %439 = vmatpush1.bf16.msra.mxu0 %v810_v57  ;;  %735 = vmatprep.subr.bf16.mxu1 %v836_v12 }
  0xfc   :  { %440 = vmatprep.subr.bf16.mxu0 %v815_v58 }
  0xfe   :  { %736 = vmatpush3.bf16.msra.mxu1 %v837_v13 }
  0xff   :  { %441 = vmatpush1.bf16.msra.mxu0 %v813_v59  ;;  %737 = vmatprep.subr.bf16.mxu1 %v838_v14 }
 0x100   :  { %442 = vmatprep.subr.bf16.mxu0 %v818_v60 }
 0x102   :  { %738 = vmatpush3.bf16.msra.mxu1 %v839_v15 }
 0x103   :  { %443 = vmatpush1.bf16.msra.mxu0 %v816_v61  ;;  %739 = vmatprep.subr.bf16.mxu1 %v840_v32 }
 0x104   :  { %444 = vmatprep.subr.bf16.mxu0 %v821_v62 }
 0x106   :  { %740 = vmatpush3.bf16.msra.mxu1 %v841_v33 }
 0x107   :  { %445 = vmatpush1.bf16.msra.mxu0 %v819_v63  ;;  %741 = vmatprep.subr.bf16.mxu1 %v842_v34 }
 0x108   :  { %446 = vmatprep.subr.bf16.mxu0 %v824_v0 }
 0x10a   :  { %742 = vmatpush3.bf16.msra.mxu1 %v843_v35 }
 0x10b   :  { %447 = vmatpush1.bf16.msra.mxu0 %v822_v1 }
 0x10c   :  { %448 = vmatprep.subr.bf16.mxu0 %v827_v2 }
 0x10f   :  { %449 = vmatpush1.bf16.msra.mxu0 %v825_v3 }
 0x1c0   :  { %v310_v16 = vpop.f32.mrb[0].mxu1 }
 0x1c1   :  { %v771_v20 = vpop.f32.mrb[1].mxu1 }
 0x1c2   :  { %v313_v21 = vpop.f32.mrb[2].mxu1 }
 0x1c3   :  { %v772_v22 = vpop.f32.mrb[3].mxu1 }
 0x1c5   :  { %v243_v23 = vpop.f32.mrb[0].mxu0 }
 0x1c6   :  { %v311_v25 = vadd.f32 %v310_v16, %v243_v23  ;;  %v759_v26 = vpop.f32.mrb[1].mxu0 }
 0x1c7   :  { %v246_v27 = vpop.f32.mrb[2].mxu0 }
 0x1c8   :  { %v323_v28 = vadd.f32 %v683_v24, %v311_v25  ;;  %v760_v29 = vpop.f32.mrb[3].mxu0 }
 0x1ca   :  { %v324_v30 = vmax.f32 %v323_v28, 0.0 }
 0x1cc   :  { %v325_v31 = vpack.c.bf16 %v324_v30, %v324_v30 }
 0x1ce   :  { %467 = vmatmul.mubr.bf16.vlgmr.msra.gmra.mrb[4].mxu0 %v325_v31 }
 0x2a1   :  { %v468_v39 = vpop.f32.mrb[4].mxu0 }
 0x2a2   :  { %v469_v40 = vadd.f32 %v468_v39, %v347_v37  ;;  %v470_v41 = vpop.f32.mrb[5].mxu0 }
 0x2a3   :  { %v471_v42 = vadd.f32 %v470_v41, %v351_v38  ;;  %v472_v43 = vpop.f32.mrb[6].mxu0 }
 0x2a4   :  { %v475_v44 = vmax.f32 %v469_v40, 0.0  ;;  %v473_v45 = vpop.f32.mrb[7].mxu0 }
 0x2a5   :  { %v476_v46 = vmax.f32 %v471_v42, 0.0 }
 0x2a6   :  { %v477_v48 = vpack.c.bf16 %v475_v44, %v475_v44 }
 0x2a7   :  { %v478_v47 = vpack.c.bf16 %v476_v46, %v476_v46 }
 0x2a9   :  { %646 = vmatprep.mubr.bf16.mxu1 %v478_v47 }
 0x2aa   :  { %647 = vmatmul.mubr.bf16.vlgmr.msra.gmra.mrb[4].mxu1 %v477_v48 }
 0x37d   :  { %v743_v49 = vpop.f32.mrb[4].mxu1 }
 0x37e   :  { %v744_v50 = vpop.f32.mrb[5].mxu1 }
 0x37f   :  { %v745_v17 = vadd.f32 %v744_v50, %v743_v49  ;;  %v746_v19 = vpop.f32.mrb[6].mxu1 }
 0x380   :  { %v747_v51 = vpop.f32.mrb[7].mxu1 }
 0x381   :  { %v649_v52 = vadd.f32 %v745_v17, %v700_v18 }
 0x383   :  { %654 = vst [vmem:[#allocation11] sm:$0xff] %v649_v52 }
 0x384   :  { %965 = shalt.err (!%p962_p2)
}
 0x385   :  { %s966_s9 = scalar_lea.hbm %s1183_s10, 128 }
 0x386   :  { %p967_p3 = scmp.ne.s32.totalorder %s1183_s10, %s966_s9  ;;  %p970_p4 = scmp.lt.u32.totalorder %s966_s9, %s1183_s10 }
 0x388   :  { %p972_p5 = pnand %p970_p4, %p967_p3 }
 0x38a   :  { %975 = shalt.err (!%p972_p5)
}
 0x38b   :  { %664 = dma.vmem_to_hbm [thread:$0]  %s662_s18, 128, %s1183_s10, [#allocation4]  }
 0x38c   :  { %982 = dma.done.wait [#allocation4], 128  }
 0x38d   :  { %983 = vsyncadd [#allocation4], 4294967168 }
 0x38e   :  { %668 = vsyncpa [#allocation3], 1 }
 0x38f   :  { %669 = vsyncpa [#allocation6], 1 }
 0x390   :  { %670 = vsyncpa [#allocation9], 1 }
 0x391   :  { %671 = vsyncpa [#allocation4], 1 }

</bundles_post_ra>
